<compile_context>
chip_gen: v5e
topology: v5e:2x2
jax: 0.10.0
libtpu: 0.0.40
codegen_flags: <defaults>
</compile_context>

<pallas_src>
import jax
import jax.numpy as jnp
from jax.experimental import pallas as pl
from jax.experimental.pallas import tpu as pltpu


def _round_up(x: int, m: int) -> int:
    return ((x + m - 1) // m) * m


def mlp_kernel(x_ref, w1_ref, b1_ref, w2_ref, b2_ref, o_ref):
    # hidden = sigmoid(x @ W1 + b1): bf16 MXU inputs, f32 accumulate/epilogue.
    x_bf16 = x_ref[...].astype(jnp.bfloat16)          # in-kernel cast (VPU, hidden under DMA/MXU)
    z1 = jnp.dot(x_bf16, w1_ref[...], preferred_element_type=jnp.float32)
    z1 = z1 + b1_ref[...]
    # sigmoid(z) = 0.5*tanh(0.5*z) + 0.5 -> single EUP transcendental per element.
    h = 0.5 * jnp.tanh(0.5 * z1) + 0.5

    # out = sigmoid(h @ W2 + b2)
    z2 = jnp.dot(h.astype(jnp.bfloat16), w2_ref[...],
                 preferred_element_type=jnp.float32)
    z2 = z2 + b2_ref[...]
    y = 0.5 * jnp.tanh(0.5 * z2) + 0.5
    o_ref[...] = y.astype(o_ref.dtype)                # bf16 writeback (values in (0,1))


def mlp_regressor_forward(x, w1, b1, w2, b2, *, block_b: int = 2048):
    """Fused MLP forward.

    x : (B, in) f32, w1 : (in, hid), b1 : (hid,), w2 : (hid, out), b2 : (out,).
    Returns (B, out) f32, matching sigmoid(sigmoid(x@W1+b1)@W2+b2).
    """
    B, in_features = x.shape
    hidden = w1.shape[1]
    out_features = w2.shape[1]

    # Pad hidden/output feature dims to full 128-lane width; batch to a tile
    # multiple.  x keeps its native (un-padded) feature dim and f32 dtype.
    HID_P = _round_up(hidden, 128)
    OUT_P = _round_up(out_features, 128)

    B8 = _round_up(B, 8)
    TB = min(_round_up(block_b, 8), B8)
    # v7x has 2 TensorCores: make sure the "parallel" batch axis has >= 2 grid
    # steps whenever the batch is large enough to split (harmless on v5e/v6e).
    if TB == B8 and B8 >= 16:
        TB = _round_up(pl.cdiv(B8, 2), 8)
    B_P = _round_up(B, TB)

    # --- wrapper-side prep (weights/biases only; tiny, done once per call) ---
    x_in = x.astype(jnp.float32)
    if B_P != B:
        x_in = jnp.pad(x_in, ((0, B_P - B), (0, 0)))   # pad batch rows only
    w1p = jnp.pad(w1, ((0, 0), (0, HID_P - hidden))).astype(jnp.bfloat16)
    w2p = jnp.pad(w2, ((0, HID_P - hidden), (0, OUT_P - out_features))).astype(jnp.bfloat16)
    b1p = jnp.pad(jnp.reshape(b1, (1, -1)),
                  ((0, 0), (0, HID_P - hidden))).astype(jnp.float32)
    b2p = jnp.pad(jnp.reshape(b2, (1, -1)),
                  ((0, 0), (0, OUT_P - out_features))).astype(jnp.float32)
    # Note: padded hidden columns produce sigmoid(0)=0.5, but the matching rows
    # of w2p are zero, so they contribute nothing to the (sliced) output.

    grid = (B_P // TB,)

    cost = pl.CostEstimate(
        flops=2 * B_P * (in_features * HID_P + HID_P * OUT_P),
        transcendentals=B_P * (HID_P + OUT_P),          # one tanh per padded element
        bytes_accessed=(B_P * in_features * 4            # x (f32 in)
                        + w1p.size * 2 + w2p.size * 2    # bf16 weights
                        + b1p.size * 4 + b2p.size * 4    # f32 biases
                        + B_P * OUT_P * 2),              # bf16 out
    )

    out_padded = pl.pallas_call(
        mlp_kernel,
        out_shape=jax.ShapeDtypeStruct((B_P, OUT_P), jnp.bfloat16),
        grid_spec=pltpu.PrefetchScalarGridSpec(
            num_scalar_prefetch=0,
            grid=grid,
            in_specs=[
                # x: tiled over batch; last dim equals full array dim (legal
                # despite in_features < 128), stays un-padded f32 in HBM.
                pl.BlockSpec((TB, in_features), lambda i: (i, 0)),
                # Weights/biases: constant index_map -> fetched once, VMEM-resident.
                pl.BlockSpec((in_features, HID_P), lambda i: (0, 0)),
                pl.BlockSpec((1, HID_P), lambda i: (0, 0)),
                pl.BlockSpec((HID_P, OUT_P), lambda i: (0, 0)),
                pl.BlockSpec((1, OUT_P), lambda i: (0, 0)),
            ],
            out_specs=pl.BlockSpec((TB, OUT_P), lambda i: (i, 0)),
        ),
        compiler_params=pltpu.CompilerParams(
            dimension_semantics=("parallel",),   # shards batch across TCs on v7x
        ),
        cost_estimate=cost,
    )(x_in, w1p, b1p, w2p, b2p)

    # Tiny final slice; upcast back to f32 to match the PyTorch module's dtype.
    return out_padded[:B, :out_features].astype(jnp.float32)


def reference_forward(x, w1, b1, w2, b2):
    h = jax.nn.sigmoid(x @ w1 + b1)
    return jax.nn.sigmoid(h @ w2 + b2)


if __name__ == "__main__":
    # Small shapes consistent with the module: batch=8, input=32, hidden=64, output=16.
    batch, input_size, hidden_size, output_size = 8, 32, 64, 16

    key = jax.random.PRNGKey(0)
    kx, kw1, kb1, kw2, kb2 = jax.random.split(key, 5)

    x = jax.random.normal(kx, (batch, input_size), dtype=jnp.float32)
    # PyTorch nn.Linear default init: U(-1/sqrt(fan_in), 1/sqrt(fan_in)); deterministic here.
    bound1 = 1.0 / jnp.sqrt(input_size)
    bound2 = 1.0 / jnp.sqrt(hidden_size)
    w1 = jax.random.uniform(kw1, (input_size, hidden_size), jnp.float32, -bound1, bound1)
    b1 = jax.random.uniform(kb1, (hidden_size,), jnp.float32, -bound1, bound1)
    w2 = jax.random.uniform(kw2, (hidden_size, output_size), jnp.float32, -bound2, bound2)
    b2 = jax.random.uniform(kb2, (output_size,), jnp.float32, -bound2, bound2)

    out = mlp_regressor_forward(x, w1, b1, w2, b2)
    out = jax.block_until_ready(out)
    ref = reference_forward(x, w1, b1, w2, b2)
    assert out.shape == (batch, output_size)
    # bf16 matmul inputs + bf16 output stream -> modest tolerance vs pure f32.
    assert jnp.allclose(out, ref, atol=1e-2, rtol=1e-2), float(jnp.max(jnp.abs(out - ref)))

    # Second check: non-multiple-of-8 batch exercises batch padding and a
    # multi-step "parallel" grid (2 TensorCore shards on v7x).
    batch2 = 300
    x2 = jax.random.normal(jax.random.PRNGKey(1), (batch2, input_size), dtype=jnp.float32)
    out2 = jax.block_until_ready(mlp_regressor_forward(x2, w1, b1, w2, b2))
    ref2 = reference_forward(x2, w1, b1, w2, b2)
    assert out2.shape == (batch2, output_size)
    assert jnp.allclose(out2, ref2, atol=1e-2, rtol=1e-2), float(jnp.max(jnp.abs(out2 - ref2)))

    print("KERNEL_OK")
</pallas_src>

<mosaic_0001>
module attributes {stable_mosaic.version = 11 : i64} {
  func.func @mlp_kernel(%arg0: i32, %arg1: memref<8x32xf32, #tpu.memory_space<vmem>>, %arg2: memref<32x128xbf16, #tpu.memory_space<vmem>>, %arg3: memref<1x128xf32, #tpu.memory_space<vmem>>, %arg4: memref<128x128xbf16, #tpu.memory_space<vmem>>, %arg5: memref<1x128xf32, #tpu.memory_space<vmem>>, %arg6: memref<8x128xbf16, #tpu.memory_space<vmem>>) attributes {dimension_semantics = [#tpu.dimension_semantics<parallel>], iteration_bounds = array<i64: 1>, scalar_prefetch = 0 : i64, scratch_operands = 0 : i64, tpu.core_type = #tpu.core_type<tc>, window_params = [{transform_indices = @transform_0, window_bounds = array<i64: 8, 32>}, {pipeline_mode = #tpu.pipeline_mode<synchronous>, transform_indices = @transform_1, window_bounds = array<i64: 32, 128>}, {pipeline_mode = #tpu.pipeline_mode<synchronous>, transform_indices = @transform_2, window_bounds = array<i64: 1, 128>}, {pipeline_mode = #tpu.pipeline_mode<synchronous>, transform_indices = @transform_3, window_bounds = array<i64: 128, 128>}, {pipeline_mode = #tpu.pipeline_mode<synchronous>, transform_indices = @transform_4, window_bounds = array<i64: 1, 128>}, {transform_indices = @transform_5, window_bounds = array<i64: 8, 128>}]} {
    %c0 = arith.constant 0 : index
    %c0_0 = arith.constant 0 : index
    %0 = vector.load %arg1[%c0, %c0_0] : memref<8x32xf32, #tpu.memory_space<vmem>>, vector<8x32xf32>
    %1 = arith.truncf %0 : vector<8x32xf32> to vector<8x32xbf16>
    %c0_1 = arith.constant 0 : index
    %c0_2 = arith.constant 0 : index
    %2 = vector.load %arg2[%c0_1, %c0_2] : memref<32x128xbf16, #tpu.memory_space<vmem>>, vector<32x128xbf16>
    %cst = arith.constant dense<0.000000e+00> : vector<8x128xf32>
    %3 = tpu.matmul %1, %2, %cst {dimension_numbers = #tpu.dot_dimension_numbers<[1], [0], [0], [1], [0, 0, 1, 1], [], []>} : vector<8x32xbf16>, vector<32x128xbf16>, vector<8x128xf32> -> vector<8x128xf32>
    %c0_3 = arith.constant 0 : index
    %c0_4 = arith.constant 0 : index
    %4 = vector.load %arg3[%c0_3, %c0_4] : memref<1x128xf32, #tpu.memory_space<vmem>>, vector<1x128xf32>
    %5 = vector.broadcast %4 : vector<1x128xf32> to vector<8x128xf32>
    %6 = arith.addf %3, %5 : vector<8x128xf32>
    %cst_5 = arith.constant 5.000000e-01 : f32
    %7 = vector.broadcast %cst_5 : f32 to vector<8x128xf32>
    %8 = arith.mulf %7, %6 : vector<8x128xf32>
    %9 = math.tanh %8 : vector<8x128xf32>
    %cst_6 = arith.constant 5.000000e-01 : f32
    %10 = vector.broadcast %cst_6 : f32 to vector<8x128xf32>
    %11 = arith.mulf %10, %9 : vector<8x128xf32>
    %cst_7 = arith.constant 5.000000e-01 : f32
    %12 = vector.broadcast %cst_7 : f32 to vector<8x128xf32>
    %13 = arith.addf %11, %12 : vector<8x128xf32>
    %14 = arith.truncf %13 : vector<8x128xf32> to vector<8x128xbf16>
    %c0_8 = arith.constant 0 : index
    %c0_9 = arith.constant 0 : index
    %15 = vector.load %arg4[%c0_8, %c0_9] : memref<128x128xbf16, #tpu.memory_space<vmem>>, vector<128x128xbf16>
    %cst_10 = arith.constant dense<0.000000e+00> : vector<8x128xf32>
    %16 = tpu.matmul %14, %15, %cst_10 {dimension_numbers = #tpu.dot_dimension_numbers<[1], [0], [0], [1], [0, 0, 1, 1], [], []>} : vector<8x128xbf16>, vector<128x128xbf16>, vector<8x128xf32> -> vector<8x128xf32>
    %c0_11 = arith.constant 0 : index
    %c0_12 = arith.constant 0 : index
    %17 = vector.load %arg5[%c0_11, %c0_12] : memref<1x128xf32, #tpu.memory_space<vmem>>, vector<1x128xf32>
    %18 = vector.broadcast %17 : vector<1x128xf32> to vector<8x128xf32>
    %19 = arith.addf %16, %18 : vector<8x128xf32>
    %cst_13 = arith.constant 5.000000e-01 : f32
    %20 = vector.broadcast %cst_13 : f32 to vector<8x128xf32>
    %21 = arith.mulf %20, %19 : vector<8x128xf32>
    %22 = math.tanh %21 : vector<8x128xf32>
    %cst_14 = arith.constant 5.000000e-01 : f32
    %23 = vector.broadcast %cst_14 : f32 to vector<8x128xf32>
    %24 = arith.mulf %23, %22 : vector<8x128xf32>
    %cst_15 = arith.constant 5.000000e-01 : f32
    %25 = vector.broadcast %cst_15 : f32 to vector<8x128xf32>
    %26 = arith.addf %24, %25 : vector<8x128xf32>
    %27 = arith.truncf %26 : vector<8x128xf32> to vector<8x128xbf16>
    %c0_16 = arith.constant 0 : index
    %c0_17 = arith.constant 0 : index
    %28 = vector.load %arg6[%c0_16, %c0_17] : memref<8x128xbf16, #tpu.memory_space<vmem>>, vector<8x128xbf16>
    tpu.vector_store %arg6[%c0_16, %c0_17], %27 {strides = array<i32>} : memref<8x128xbf16, #tpu.memory_space<vmem>>, vector<8x128xbf16>,
    return
  }
  func.func @transform_0(%arg0: i32) -> (i32, i32) {
    %c0_i32 = arith.constant 0 : i32
    %c0_i32_0 = arith.constant 0 : i32
    return %arg0, %c0_i32 : i32, i32
  }
  func.func @transform_1(%arg0: i32) -> (i32, i32) {
    %c0_i32 = arith.constant 0 : i32
    %c0_i32_0 = arith.constant 0 : i32
    %c0_i32_1 = arith.constant 0 : i32
    return %c0_i32, %c0_i32_0 : i32, i32
  }
  func.func @transform_2(%arg0: i32) -> (i32, i32) {
    %c0_i32 = arith.constant 0 : i32
    %c0_i32_0 = arith.constant 0 : i32
    %c0_i32_1 = arith.constant 0 : i32
    return %c0_i32, %c0_i32_0 : i32, i32
  }
  func.func @transform_3(%arg0: i32) -> (i32, i32) {
    %c0_i32 = arith.constant 0 : i32
    %c0_i32_0 = arith.constant 0 : i32
    %c0_i32_1 = arith.constant 0 : i32
    return %c0_i32, %c0_i32_0 : i32, i32
  }
  func.func @transform_4(%arg0: i32) -> (i32, i32) {
    %c0_i32 = arith.constant 0 : i32
    %c0_i32_0 = arith.constant 0 : i32
    %c0_i32_1 = arith.constant 0 : i32
    return %c0_i32, %c0_i32_0 : i32, i32
  }
  func.func @transform_5(%arg0: i32) -> (i32, i32) {
    %c0_i32 = arith.constant 0 : i32
    %c0_i32_0 = arith.constant 0 : i32
    return %arg0, %c0_i32 : i32, i32
  }
}

</mosaic_0001>

<bundles_post_ra>
// kernel: tpu_custom_call.1
= control target key start
LH: loop header
LB: loop body
LE: loop exit
PB: predicated region body
PF: predicated region fallthrough
CT: control target
= control target key end

     0   :  { %10 = vsyncpa [#allocation3], 0  ;;  %s435_s0 = inlined_call_operand.hbm [shape: f32[8,32], index: 0, kind: input, shape index: {}]   ;;  %s436_s1 = inlined_call_operand.hbm [shape: bf16[32,128], index: 1, kind: input, shape index: {}]   ;;  %s437_s2 = inlined_call_operand.vmem [shape: f32[1,128], index: 2, kind: input, shape index: {}]   ;;  %s438_s3 = inlined_call_operand.hbm [shape: bf16[128,128], index: 3, kind: input, shape index: {}]   ;;  %s439_s4 = inlined_call_operand.vmem [shape: f32[1,128], index: 4, kind: input, shape index: {}]   ;;  %s440_s5 = inlined_call_operand.hbm [shape: bf16[8,128], index: 5, kind: output, shape index: {}]  }
   0x1   :  { %11 = vsyncpa [#allocation6], 0  ;;  %s28_s20 = sshll.u32 %s436_s1, 4  ;;  %s29_s20 = int_to_ptr.hbm [resolvable:$true] %s28_s20 }
   0x2   :  { %12 = vsyncpa [#allocation4], 0  ;;  %s381_s21 = smov [#allocation5]   ;;  %s18_s25 = sshll.u32 %s435_s0, 4  ;;  %s19_s25 = int_to_ptr.hbm [resolvable:$true] %s18_s25 }
   0x3   :  { %s30_s22 = sshll.u32 %s381_s21, 4  ;;  %s382_s26 = smov 64   ;;  %s31_s22 = int_to_ptr.vmem [resolvable:$true] %s30_s22 }
   0x4   :  { %s383_s27 = smov 4   ;;  %s384_s28 = smov [#allocation2]  }
   0x5   :  { %36 = dma.hbm_to_vmem [thread:$0]  %s29_s20, 256, %s31_s22, [#allocation6], %s382_s26, %s382_s26, %s383_s27  }
   0x6   :  { %s20_s29 = sshll.u32 %s384_s28, 4  ;;  %s43_s7 = sshll.u32 %s438_s3, 4  ;;  %s21_s29 = int_to_ptr.vmem [resolvable:$true] %s20_s29  ;;  %s44_s7 = int_to_ptr.hbm [resolvable:$true] %s43_s7 }
   0x7   :  { %23 = dma.hbm_to_vmem [thread:$0]  %s19_s25, 128, %s21_s29, [#allocation3]  }
   0x8   :  { %s385_s1 = smov [#allocation7]  }
   0x9   :  { %s45_s8 = sshll.u32 %s385_s1, 4  ;;  %s46_s8 = int_to_ptr.vmem [resolvable:$true] %s45_s8 }
   0xa   :  { %51 = dma.hbm_to_vmem [thread:$0]  %s44_s7, 1024, %s46_s8, [#allocation6], %s382_s26, %s382_s26, %s383_s27  }
   0xb   :  { %375 = dma.done.wait [#allocation3], 128  }
   0xc   :  { %376 = vsyncadd [#allocation3], 4294967168 }
   0xd   :  { %377 = dma.done.wait [#allocation6], 1280  }
   0xe   :  { %378 = vsyncadd [#allocation6], 4294966016  ;;  %v258_v0 = vld [vmem:[#allocation5 + $0x8] sm:$0xff]  ;;  %v257_v2 = vld [vmem:[#allocation5] sm:$0xff]  ;;  %vm89_vm0 = vcmask 261120   ;;  %s205_s14 = sshll.u32 %s440_s5, 4  ;;  %s206_s14 = int_to_ptr.hbm [resolvable:$true] %s205_s14 }
   0xf   :  { %v266_v1 = vld [vmem:[#allocation7 + $0x38] sm:$0xff]  ;;  %99 = vmatpush.bf16.msra.mxu0 %v258_v0  ;;  %v67_v3 = vld [vmem:[#allocation2] sm:$0xff]  ;;  %v265_v4 = vld [vmem:[#allocation7 + $0x30] sm:$0xff] }
  0x10   :  { %179 = vmatpush.bf16.msra.mxu1 %v266_v1  ;;  %v68_v5 = vpack.c.bf16 %v67_v3, %v67_v3  ;;  %v264_v6 = vld [vmem:[#allocation7 + $0x28] sm:$0xff]  ;;  %v263_v7 = vld [vmem:[#allocation7 + $0x20] sm:$0xff]  ;;  %v262_v8 = vld [vmem:[#allocation7 + $0x18] sm:$0xff] }
  0x11   :  { %v261_v9 = vld [vmem:[#allocation7 + $0x10] sm:$0xff]  ;;  %v260_v10 = vld [vmem:[#allocation7 + $0x8] sm:$0xff]  ;;  %v259_v11 = vld [vmem:[#allocation7] sm:$0xff] }
  0x12   :  { %v273_v12 = vld [vmem:[%s437_s2] ss:$0 sm:$0xff]  ;;  %s386_s2 = smov [#allocation8]  }
  0x13   :  { %100 = vmatpush.bf16.msra.mxu0 %v257_v2  ;;  %v274_v21 = vld [vmem:[%s439_s4] ss:$0 sm:$0xff]  ;;  %s203_s11 = sshll.u32 %s386_s2, 4  ;;  %s204_s11 = int_to_ptr.vmem [resolvable:$true] %s203_s11 }
  0x14   :  { %180 = vmatpush.bf16.msra.mxu1 %v265_v4 }
  0x16   :  { %224 = vmatmul.msk.bf16.vlgmr.msra.gmra.mxu0 %vm89_vm0, %v68_v5 }
  0x18   :  { %181 = vmatpush.bf16.msra.mxu1 %v264_v6 }
  0x1c   :  { %182 = vmatpush.bf16.msra.mxu1 %v263_v7 }
  0x20   :  { %183 = vmatpush.bf16.msra.mxu1 %v262_v8 }
  0x24   :  { %184 = vmatpush.bf16.msra.mxu1 %v261_v9 }
  0x28   :  { %185 = vmatpush.bf16.msra.mxu1 %v260_v10 }
  0x2c   :  { %186 = vmatpush.bf16.msra.mxu1 %v259_v11 }
  0x93   :  { %v102_v13 = vpop.f32.mrf.mxu0 }
  0x94   :  { %v103_v14 = vadd.f32 %v273_v12, %v102_v13 }
  0x96   :  { %v106_v15 = vmul.f32 0.5, %v103_v14 }
  0x98   :  { %275 = vtanh.f32 %v106_v15 }
  0x9b   :  { %v104_v16 = vpop.f32.mrf.mxu0 }
  0x9e   :  { %v276_v17 = vpop.eup %275 }
  0x9f   :  { %v108_v18 = vmul.f32 0.5, %v276_v17 }
  0xa1   :  { %v109_v19 = vadd.f32 0.5, %v108_v18 }
  0xa3   :  { %v110_v20 = vpack.c.bf16 %v109_v19, %v109_v19 }
  0xa5   :  { %187 = vmatmul.bf16.vlgmr.msra.gmra.mxu1 %v110_v20 }
 0x122   :  { %v188_v22 = vpop.f32.mrf.mxu1 }
 0x123   :  { %v189_v23 = vadd.f32 %v274_v21, %v188_v22 }
 0x125   :  { %v192_v24 = vmul.f32 0.5, %v189_v23 }
 0x127   :  { %277 = vtanh.f32 %v192_v24 }
 0x12a   :  { %v190_v25 = vpop.f32.mrf.mxu1 }
 0x12d   :  { %v278_v26 = vpop.eup %277 }
 0x12e   :  { %v194_v27 = vmul.f32 0.5, %v278_v26 }
 0x130   :  { %v195_v28 = vadd.f32 0.5, %v194_v27 }
 0x132   :  { %v196_v29 = vpack.c.bf16 %v195_v28, %v195_v28 }
 0x134   :  { %197 = vst [vmem:[#allocation8] sm:$0xf] %v196_v29 }
 0x135   :  { %208 = dma.vmem_to_hbm [thread:$0]  %s204_s11, 64, %s206_s14, [#allocation4]  }
 0x136   :  { %379 = dma.done.wait [#allocation4], 64  }
 0x137   :  { %380 = vsyncadd [#allocation4], 4294967232 }
 0x138   :  { %213 = vsyncpa [#allocation3], 1 }
 0x139   :  { %214 = vsyncpa [#allocation6], 1 }
 0x13a   :  { %215 = vsyncpa [#allocation4], 1 }

</bundles_post_ra>
